<compile_context>
chip_gen: v7x
topology: tpu7x:2x2x1
jax: 0.10.0
libtpu: 0.0.40
codegen_flags: <defaults>
</compile_context>

<pallas_src>
import jax
import jax.numpy as jnp
from jax.experimental import pallas as pl
from jax.experimental.pallas import tpu as pltpu

# ---------------------------------------------------------------------------
# Small, module-consistent shapes
# ---------------------------------------------------------------------------
B = 2                       # batch
C_IN = 3                    # RGB input (EfficientNet takes 3-channel images)
H = W = 16                  # spatial
KSZ = 3                     # stem conv kernel
STRIDE = 2
PAD = 1
C_STEM = 8                  # stem conv channels (stand-in for 40)
IN_FEATURES = 64            # stand-in for EfficientNet-B3's 1536
HIDDEN = IN_FEATURES // 2   # Linear(in_features, in_features // 2)
BN_EPS = 1e-5

HO = (H + 2 * PAD - KSZ) // STRIDE + 1
WO = (W + 2 * PAD - KSZ) // STRIDE + 1
HW = HO * WO                # 64
ROWS = B * HW               # 128  (sublane-aligned, lane-friendly M dim)
PATCH = KSZ * KSZ * C_IN    # 27

# Lane-dense padded dims (everything padded with zeros -> numerically exact).
LANE = 128
SUB = 8                     # sublane-dense rows for the pooled / output blocks
PATCH_P = LANE              # stem contraction dim  27  -> 128
C_STEM_P = LANE             # stem output channels   8  -> 128
FEAT_P = LANE               # backbone features     64  -> 128
HID_P = LANE                # classifier hidden     32  -> 128
OUT_P = LANE                # final logit            1  -> 128

# Rows of the packed (8, LANE) vector buffer.
ROW_SHIFT_STEM = 0
ROW_SHIFT_HEAD = 1
ROW_B1 = 2
ROW_B2 = 3


# ---------------------------------------------------------------------------
# One fused Pallas kernel (single invocation, no grid):
#   stem conv (BN scale folded) -> +shift -> SiLU ->
#   1x1 head conv (BN scale folded) -> +shift -> SiLU ->
#   global avg pool (as matmul) -> Linear -> ReLU -> (Dropout=id) -> Linear
# ---------------------------------------------------------------------------
def _fused_kernel(p_ref, w_stem_ref, w_head_ref, w1_ref, w2_ref,
                  vec_ref, pool_ref, o_ref):
    shift_stem = vec_ref[ROW_SHIFT_STEM:ROW_SHIFT_STEM + 1, :]   # (1, LANE) f32
    shift_head = vec_ref[ROW_SHIFT_HEAD:ROW_SHIFT_HEAD + 1, :]
    b1 = vec_ref[ROW_B1:ROW_B1 + 1, :]
    b2 = vec_ref[ROW_B2:ROW_B2 + 1, :]

    # ---- stem conv (im2col'd matmul; BN scale pre-folded into weights) ----
    y = jnp.dot(p_ref[...], w_stem_ref[...],
                preferred_element_type=jnp.float32)          # (ROWS, C_STEM_P) f32
    y = y + shift_stem                                       # folded BN shift
    y = y * pl.reciprocal(1.0 + jnp.exp(-y), approx=True)    # SiLU (exp+rcp on EUP)

    # ---- 1x1 head conv (single matmul over all batches; BN folded) ----
    z = jnp.dot(y.astype(jnp.bfloat16), w_head_ref[...],
                preferred_element_type=jnp.float32)          # (ROWS, FEAT_P) f32
    z = z + shift_head
    z = z * pl.reciprocal(1.0 + jnp.exp(-z), approx=True)    # SiLU

    # ---- global average pool per batch (AdaptiveAvgPool2d(1)) as matmul ----
    # pool is (SUB, ROWS) with 1/HW in row b over that batch's spatial rows.
    feats = jnp.dot(pool_ref[...], z.astype(jnp.bfloat16),
                    preferred_element_type=jnp.float32)      # (SUB, FEAT_P) f32

    # ---- backbone.classifier: Linear -> ReLU -> Dropout(0.3)=identity ----
    h = jnp.dot(feats.astype(jnp.bfloat16), w1_ref[...],
                preferred_element_type=jnp.float32) + b1     # (SUB, HID_P)
    h = jnp.maximum(h, 0.0)                                  # ReLU

    # ---- self.fc: Linear(HIDDEN, 1) (padded to lane-dense 128 cols) ----
    o = jnp.dot(h.astype(jnp.bfloat16), w2_ref[...],
                preferred_element_type=jnp.float32) + b2     # (SUB, OUT_P)
    o_ref[...] = o                                           # full unmasked vst


# ---------------------------------------------------------------------------
# Glue: im2col, parameter init (BN folding + zero padding), pallas_call wrapper
# ---------------------------------------------------------------------------
def _im2col(x_nhwc, k, stride, pad):
    b, h, w, c = x_nhwc.shape
    xp = jnp.pad(x_nhwc, ((0, 0), (pad, pad), (pad, pad), (0, 0)))
    ho = (h + 2 * pad - k) // stride + 1
    wo = (w + 2 * pad - k) // stride + 1
    patches = []
    for dy in range(k):
        for dx in range(k):
            patches.append(
                xp[:, dy:dy + stride * ho:stride, dx:dx + stride * wo:stride, :])
    out = jnp.concatenate(patches, axis=-1)          # [B, HO, WO, k*k*C]
    return out.reshape(b, ho * wo, k * k * c)


def _pad2(a, rows, cols):
    return jnp.pad(a, ((0, rows - a.shape[0]), (0, cols - a.shape[1])))


def init_params(key):
    ks = jax.random.split(key, 8)
    f32 = jnp.float32
    bf16 = jnp.bfloat16

    # stem conv (bias-free, like EfficientNet) + BN params (eval-mode)
    w_stem = jax.random.normal(ks[0], (PATCH, C_STEM), f32) * 0.1
    g_stem = 1.0 + 0.01 * jax.random.normal(ks[1], (C_STEM,), f32)
    b_stem = 0.01 * jax.random.normal(ks[2], (C_STEM,), f32)
    mean_stem = jnp.zeros((C_STEM,), f32)
    var_stem = jnp.ones((C_STEM,), f32)
    scale_stem = g_stem / jnp.sqrt(var_stem + BN_EPS)
    shift_stem = b_stem - mean_stem * scale_stem
    w_stem_folded = w_stem * scale_stem[None, :]     # fold BN scale into conv

    # 1x1 head conv + BN params (general folding formula; running stats = 0/1
    # for this random-init stand-in)
    w_head = jax.random.normal(ks[3], (C_STEM, IN_FEATURES), f32) * 0.1
    g_head = 1.0 + 0.01 * jax.random.normal(ks[4], (IN_FEATURES,), f32)
    b_head = 0.01 * jax.random.normal(ks[5], (IN_FEATURES,), f32)
    mean_head = jnp.zeros((IN_FEATURES,), f32)
    var_head = jnp.ones((IN_FEATURES,), f32)
    scale_head = g_head / jnp.sqrt(var_head + BN_EPS)
    shift_head = b_head - mean_head * scale_head
    w_head_folded = w_head * scale_head[None, :]

    # classifier: Linear(IN_FEATURES, HIDDEN), fc: Linear(HIDDEN, 1)
    w1 = jax.random.normal(ks[6], (IN_FEATURES, HIDDEN), f32) * (1.0 / jnp.sqrt(IN_FEATURES))
    b1 = jnp.zeros((HIDDEN,), f32)
    w2 = jax.random.normal(ks[7], (HIDDEN, 1), f32) * (1.0 / jnp.sqrt(HIDDEN))
    b2 = jnp.zeros((1,), f32)

    # Pack the four small per-channel vectors into one sublane-dense (8, LANE)
    # f32 buffer (zero-padded columns keep the padded lanes numerically inert).
    vecs = jnp.zeros((SUB, LANE), f32)
    vecs = vecs.at[ROW_SHIFT_STEM, :C_STEM].set(shift_stem)
    vecs = vecs.at[ROW_SHIFT_HEAD, :IN_FEATURES].set(shift_head)
    vecs = vecs.at[ROW_B1, :HIDDEN].set(b1)
    vecs = vecs.at[ROW_B2, :1].set(b2)

    # Global-average-pool matrix: row b has 1/HW over batch b's spatial rows.
    row_batch = jnp.arange(ROWS) // HW                        # (ROWS,)
    pool = jnp.where(
        (jnp.arange(SUB)[:, None] == row_batch[None, :])
        & (jnp.arange(SUB)[:, None] < B),
        jnp.float32(1.0 / HW), 0.0).astype(bf16)              # (SUB, ROWS)

    # Zero-pad weights to lane-dense shapes, store bf16 for the MXU feed
    # (accumulation stays f32 in-kernel).  Padded columns/rows are exactly 0.
    return dict(
        w_stem=_pad2(w_stem_folded, PATCH_P, C_STEM_P).astype(bf16),
        w_head=_pad2(w_head_folded, C_STEM_P, FEAT_P).astype(bf16),
        w1=_pad2(w1, FEAT_P, HID_P).astype(bf16),
        w2=_pad2(w2, HID_P, OUT_P).astype(bf16),
        vecs=vecs,
        pool=pool,
    )


def enhanced_dr_model_forward(x_nchw, params):
    # NCHW -> NHWC, im2col, pad contraction dim 27 -> 128 (zeros), bf16 MXU feed.
    x = jnp.transpose(x_nchw, (0, 2, 3, 1)).astype(jnp.float32)
    patches = _im2col(x, KSZ, STRIDE, PAD).reshape(ROWS, PATCH)
    patches = jnp.pad(patches, ((0, 0), (0, PATCH_P - PATCH))).astype(jnp.bfloat16)

    vmem = pl.BlockSpec(memory_space=pltpu.MemorySpace.VMEM)

    cost = pl.CostEstimate(
        flops=2 * (ROWS * PATCH_P * C_STEM_P          # stem matmul
                   + ROWS * C_STEM_P * FEAT_P         # head matmul
                   + SUB * ROWS * FEAT_P              # pool matmul
                   + SUB * FEAT_P * HID_P             # classifier Linear
                   + SUB * HID_P * OUT_P),            # fc Linear
        transcendentals=4 * ROWS * LANE,              # 2x exp + 2x recip
        bytes_accessed=(ROWS * PATCH_P * 2            # patches (bf16)
                        + 4 * LANE * LANE * 2         # weights (bf16)
                        + SUB * LANE * 4              # vecs (f32)
                        + SUB * ROWS * 2              # pool (bf16)
                        + SUB * OUT_P * 4))           # output (f32)

    out_padded = pl.pallas_call(
        _fused_kernel,
        out_shape=jax.ShapeDtypeStruct((SUB, OUT_P), jnp.float32),
        in_specs=[vmem] * 7,
        out_specs=vmem,
        cost_estimate=cost,
    )(patches,
      params["w_stem"], params["w_head"], params["w1"], params["w2"],
      params["vecs"], params["pool"])

    return out_padded[:B, :1]   # [B, 1], matches PyTorch self.fc(features)


if __name__ == "__main__":
    key = jax.random.PRNGKey(0)
    k_x, k_p = jax.random.split(key)
    x = jax.random.normal(k_x, (B, C_IN, H, W), jnp.float32)  # NCHW like PyTorch
    params = init_params(k_p)

    out = jax.jit(enhanced_dr_model_forward)(x, params)
    out = jax.block_until_ready(out)
    assert out.shape == (B, 1) and out.dtype == jnp.float32
    assert bool(jnp.all(jnp.isfinite(out)))
    print("KERNEL_OK")
</pallas_src>

<mosaic_0001>
module attributes {stable_mosaic.version = 11 : i64} {
  func.func @_fused_kernel(%arg0: memref<128x128xbf16, #tpu.memory_space<vmem>>, %arg1: memref<128x128xbf16, #tpu.memory_space<vmem>>, %arg2: memref<128x128xbf16, #tpu.memory_space<vmem>>, %arg3: memref<128x128xbf16, #tpu.memory_space<vmem>>, %arg4: memref<128x128xbf16, #tpu.memory_space<vmem>>, %arg5: memref<8x128xf32, #tpu.memory_space<vmem>>, %arg6: memref<8x128xbf16, #tpu.memory_space<vmem>>, %arg7: memref<8x128xf32, #tpu.memory_space<vmem>>) attributes {dimension_semantics = [], scalar_prefetch = 0 : i64, scratch_operands = 0 : i64, tpu.core_type = #tpu.core_type<tc>} {
    %c0 = arith.constant 0 : index
    %c0_0 = arith.constant 0 : index
    %0 = vector.load %arg5[%c0, %c0_0] : memref<8x128xf32, #tpu.memory_space<vmem>>, vector<1x128xf32>
    %c1 = arith.constant 1 : index
    %c0_1 = arith.constant 0 : index
    %1 = vector.load %arg5[%c1, %c0_1] : memref<8x128xf32, #tpu.memory_space<vmem>>, vector<1x128xf32>
    %c2 = arith.constant 2 : index
    %c0_2 = arith.constant 0 : index
    %2 = vector.load %arg5[%c2, %c0_2] : memref<8x128xf32, #tpu.memory_space<vmem>>, vector<1x128xf32>
    %c3 = arith.constant 3 : index
    %c0_3 = arith.constant 0 : index
    %3 = vector.load %arg5[%c3, %c0_3] : memref<8x128xf32, #tpu.memory_space<vmem>>, vector<1x128xf32>
    %c0_4 = arith.constant 0 : index
    %c0_5 = arith.constant 0 : index
    %4 = vector.load %arg0[%c0_4, %c0_5] : memref<128x128xbf16, #tpu.memory_space<vmem>>, vector<128x128xbf16>
    %c0_6 = arith.constant 0 : index
    %c0_7 = arith.constant 0 : index
    %5 = vector.load %arg1[%c0_6, %c0_7] : memref<128x128xbf16, #tpu.memory_space<vmem>>, vector<128x128xbf16>
    %cst = arith.constant dense<0.000000e+00> : vector<128x128xf32>
    %6 = tpu.matmul %4, %5, %cst {dimension_numbers = #tpu.dot_dimension_numbers<[1], [0], [0], [1], [0, 0, 1, 1], [], []>} : vector<128x128xbf16>, vector<128x128xbf16>, vector<128x128xf32> -> vector<128x128xf32>
    %7 = vector.broadcast %0 : vector<1x128xf32> to vector<128x128xf32>
    %8 = arith.addf %6, %7 : vector<128x128xf32>
    %cst_8 = arith.constant 0.000000e+00 : f32
    %9 = vector.broadcast %cst_8 : f32 to vector<128x128xf32>
    %10 = arith.subf %9, %8 : vector<128x128xf32>
    %11 = math.exp %10 : vector<128x128xf32>
    %cst_9 = arith.constant 1.000000e+00 : f32
    %12 = vector.broadcast %cst_9 : f32 to vector<128x128xf32>
    %13 = arith.addf %12, %11 : vector<128x128xf32>
    %14 = tpu.reciprocal %13 {approx = true} : vector<128x128xf32> -> vector<128x128xf32>
    %15 = arith.mulf %8, %14 : vector<128x128xf32>
    %16 = arith.truncf %15 : vector<128x128xf32> to vector<128x128xbf16>
    %c0_10 = arith.constant 0 : index
    %c0_11 = arith.constant 0 : index
    %17 = vector.load %arg2[%c0_10, %c0_11] : memref<128x128xbf16, #tpu.memory_space<vmem>>, vector<128x128xbf16>
    %cst_12 = arith.constant dense<0.000000e+00> : vector<128x128xf32>
    %18 = tpu.matmul %16, %17, %cst_12 {dimension_numbers = #tpu.dot_dimension_numbers<[1], [0], [0], [1], [0, 0, 1, 1], [], []>} : vector<128x128xbf16>, vector<128x128xbf16>, vector<128x128xf32> -> vector<128x128xf32>
    %19 = vector.broadcast %1 : vector<1x128xf32> to vector<128x128xf32>
    %20 = arith.addf %18, %19 : vector<128x128xf32>
    %cst_13 = arith.constant 0.000000e+00 : f32
    %21 = vector.broadcast %cst_13 : f32 to vector<128x128xf32>
    %22 = arith.subf %21, %20 : vector<128x128xf32>
    %23 = math.exp %22 : vector<128x128xf32>
    %cst_14 = arith.constant 1.000000e+00 : f32
    %24 = vector.broadcast %cst_14 : f32 to vector<128x128xf32>
    %25 = arith.addf %24, %23 : vector<128x128xf32>
    %26 = tpu.reciprocal %25 {approx = true} : vector<128x128xf32> -> vector<128x128xf32>
    %27 = arith.mulf %20, %26 : vector<128x128xf32>
    %c0_15 = arith.constant 0 : index
    %c0_16 = arith.constant 0 : index
    %28 = vector.load %arg6[%c0_15, %c0_16] : memref<8x128xbf16, #tpu.memory_space<vmem>>, vector<8x128xbf16>
    %29 = arith.truncf %27 : vector<128x128xf32> to vector<128x128xbf16>
    %cst_17 = arith.constant dense<0.000000e+00> : vector<8x128xf32>
    %30 = tpu.matmul %28, %29, %cst_17 {dimension_numbers = #tpu.dot_dimension_numbers<[1], [0], [0], [1], [0, 0, 1, 1], [], []>} : vector<8x128xbf16>, vector<128x128xbf16>, vector<8x128xf32> -> vector<8x128xf32>
    %31 = arith.truncf %30 : vector<8x128xf32> to vector<8x128xbf16>
    %c0_18 = arith.constant 0 : index
    %c0_19 = arith.constant 0 : index
    %32 = vector.load %arg3[%c0_18, %c0_19] : memref<128x128xbf16, #tpu.memory_space<vmem>>, vector<128x128xbf16>
    %cst_20 = arith.constant dense<0.000000e+00> : vector<8x128xf32>
    %33 = tpu.matmul %31, %32, %cst_20 {dimension_numbers = #tpu.dot_dimension_numbers<[1], [0], [0], [1], [0, 0, 1, 1], [], []>} : vector<8x128xbf16>, vector<128x128xbf16>, vector<8x128xf32> -> vector<8x128xf32>
    %34 = vector.broadcast %2 : vector<1x128xf32> to vector<8x128xf32>
    %35 = arith.addf %33, %34 : vector<8x128xf32>
    %cst_21 = arith.constant 0.000000e+00 : f32
    %36 = vector.broadcast %cst_21 : f32 to vector<8x128xf32>
    %37 = arith.maximumf %35, %36 : vector<8x128xf32>
    %38 = arith.truncf %37 : vector<8x128xf32> to vector<8x128xbf16>
    %c0_22 = arith.constant 0 : index
    %c0_23 = arith.constant 0 : index
    %39 = vector.load %arg4[%c0_22, %c0_23] : memref<128x128xbf16, #tpu.memory_space<vmem>>, vector<128x128xbf16>
    %cst_24 = arith.constant dense<0.000000e+00> : vector<8x128xf32>
    %40 = tpu.matmul %38, %39, %cst_24 {dimension_numbers = #tpu.dot_dimension_numbers<[1], [0], [0], [1], [0, 0, 1, 1], [], []>} : vector<8x128xbf16>, vector<128x128xbf16>, vector<8x128xf32> -> vector<8x128xf32>
    %41 = vector.broadcast %3 : vector<1x128xf32> to vector<8x128xf32>
    %42 = arith.addf %40, %41 : vector<8x128xf32>
    %c0_25 = arith.constant 0 : index
    %c0_26 = arith.constant 0 : index
    %43 = vector.load %arg7[%c0_25, %c0_26] : memref<8x128xf32, #tpu.memory_space<vmem>>, vector<8x128xf32>
    tpu.vector_store %arg7[%c0_25, %c0_26], %42 {strides = array<i32>} : memref<8x128xf32, #tpu.memory_space<vmem>>, vector<8x128xf32>,
    return
  }
}

</mosaic_0001>

<bundles_post_ra>
// kernel: enhanced_dr_model_forward.1
= control target key start
LH: loop header
LB: loop body
LE: loop exit
PB: predicated region body
PF: predicated region fallthrough
CT: control target
= control target key end

     0   :  { %vm1296_vm0 = vmmov 0   ;;  %s1669_s1 = inlined_call_operand.vmem [shape: bf16[128,128], index: 1, kind: input, shape index: {}]   ;;  %s1670_s0 = inlined_call_operand.vmem [shape: bf16[128,128], index: 0, kind: input, shape index: {}]   ;;  %s1671_s2 = inlined_call_operand.vmem [shape: bf16[128,128], index: 2, kind: input, shape index: {}]   ;;  %s1672_s5 = inlined_call_operand.vmem [shape: f32[8,128], index: 5, kind: input, shape index: {}]   ;;  %s1673_s3 = inlined_call_operand.vmem [shape: bf16[128,128], index: 3, kind: input, shape index: {}]   ;;  %s1674_s6 = inlined_call_operand.vmem [shape: bf16[8,128], index: 6, kind: input, shape index: {}]   ;;  %s1675_s4 = inlined_call_operand.vmem [shape: bf16[128,128], index: 4, kind: input, shape index: {}]   ;;  %s1676_s7 = inlined_call_operand.vmem [shape: f32[8,128], index: 7, kind: output, shape index: {}]  }
   0x1   :  { %v1127_v0 = vld [vmem:[%s1669_s1] sm:$0xff]   ;;  %v1128_v1 = vld [vmem:[%s1669_s1 + $0x8] sm:$0xff]   ;;  %v1129_v2 = vld [vmem:[%s1669_s1 + $0x10] sm:$0xff]  }
   0x2   :  { %1001 = vmatprep.subr.bf16.mxu0 %v1127_v0  ;;  %v1130_v3 = vld [vmem:[%s1669_s1 + $0x18] sm:$0xff]   ;;  %v1135_v4 = vld [vmem:[%s1670_s0] sm:$0xff]   ;;  %v1132_v6 = vld [vmem:[%s1669_s1 + $0x28] sm:$0xff]  }
   0x3   :  { %1002 = vmatpush3.bf16.msra.mxu0 %v1127_v0  ;;  %1017 = vmatprep.mubr.bf16.mxu0 %v1135_v4  ;;  %v1131_v5 = vld [vmem:[%s1669_s1 + $0x20] sm:$0xff]   ;;  %v1133_v7 = vld [vmem:[%s1669_s1 + $0x30] sm:$0xff]   ;;  %v1134_v8 = vld [vmem:[%s1669_s1 + $0x38] sm:$0xff]  }
   0x4   :  { %1003 = vmatprep.subr.bf16.mxu0 %v1128_v1  ;;  %v1136_v9 = vld [vmem:[%s1670_s0 + $0x8] sm:$0xff]   ;;  %v1137_v10 = vld [vmem:[%s1670_s0 + $0x10] sm:$0xff]   ;;  %v1138_v11 = vld [vmem:[%s1670_s0 + $0x18] sm:$0xff]  }
   0x5   :  { %v1139_v12 = vld [vmem:[%s1670_s0 + $0x20] sm:$0xff]   ;;  %v1140_v13 = vld [vmem:[%s1670_s0 + $0x28] sm:$0xff]   ;;  %v1141_v14 = vld [vmem:[%s1670_s0 + $0x30] sm:$0xff]  }
   0x6   :  { %v1142_v15 = vld [vmem:[%s1670_s0 + $0x38] sm:$0xff]   ;;  %v1143_v16 = vld [vmem:[%s1671_s2] sm:$0xff]   ;;  %v1144_v17 = vld [vmem:[%s1671_s2 + $0x8] sm:$0xff]  }
   0x7   :  { %1004 = vmatpush3.bf16.msra.mxu0 %v1128_v1  ;;  %1033 = vmatprep.subr.bf16.mxu1 %v1143_v16  ;;  %v1145_v18 = vld [vmem:[%s1671_s2 + $0x10] sm:$0xff]   ;;  %v1146_v19 = vld [vmem:[%s1671_s2 + $0x18] sm:$0xff]   ;;  %v1147_v20 = vld [vmem:[%s1671_s2 + $0x20] sm:$0xff]  }
   0x8   :  { %1005 = vmatprep.subr.bf16.mxu0 %v1129_v2  ;;  %1034 = vmatpush3.bf16.msra.mxu1 %v1143_v16  ;;  %v1148_v21 = vld [vmem:[%s1671_s2 + $0x28] sm:$0xff]   ;;  %v1149_v22 = vld [vmem:[%s1671_s2 + $0x30] sm:$0xff]   ;;  %v1150_v23 = vld [vmem:[%s1671_s2 + $0x38] sm:$0xff]  }
   0x9   :  { %1035 = vmatprep.subr.bf16.mxu1 %v1144_v17  ;;  %v1412_v24 = vld [vmem:[%s1672_s5] ss:$0 sm:$0xff] }
   0xb   :  { %1006 = vmatpush3.bf16.msra.mxu0 %v1129_v2 }
   0xc   :  { %1007 = vmatprep.subr.bf16.mxu0 %v1130_v3  ;;  %1036 = vmatpush3.bf16.msra.mxu1 %v1144_v17 }
   0xd   :  { %1037 = vmatprep.subr.bf16.mxu1 %v1145_v18 }
   0xf   :  { %1008 = vmatpush3.bf16.msra.mxu0 %v1130_v3 }
  0x10   :  { %1009 = vmatprep.subr.bf16.mxu0 %v1131_v5  ;;  %1038 = vmatpush3.bf16.msra.mxu1 %v1145_v18 }
  0x11   :  { %1039 = vmatprep.subr.bf16.mxu1 %v1146_v19 }
  0x13   :  { %1010 = vmatpush3.bf16.msra.mxu0 %v1131_v5 }
  0x14   :  { %1011 = vmatprep.subr.bf16.mxu0 %v1132_v6  ;;  %1040 = vmatpush3.bf16.msra.mxu1 %v1146_v19 }
  0x15   :  { %1041 = vmatprep.subr.bf16.mxu1 %v1147_v20 }
  0x17   :  { %1012 = vmatpush3.bf16.msra.mxu0 %v1132_v6 }
  0x18   :  { %1013 = vmatprep.subr.bf16.mxu0 %v1133_v7  ;;  %1042 = vmatpush3.bf16.msra.mxu1 %v1147_v20 }
  0x19   :  { %1043 = vmatprep.subr.bf16.mxu1 %v1148_v21 }
  0x1b   :  { %1014 = vmatpush3.bf16.msra.mxu0 %v1133_v7 }
  0x1c   :  { %1015 = vmatprep.subr.bf16.mxu0 %v1134_v8  ;;  %1044 = vmatpush3.bf16.msra.mxu1 %v1148_v21 }
  0x1d   :  { %1045 = vmatprep.subr.bf16.mxu1 %v1149_v22 }
  0x1f   :  { %1016 = vmatpush3.bf16.msra.mxu0 %v1134_v8 }
  0x20   :  { %1046 = vmatpush3.bf16.msra.mxu1 %v1149_v22 }
  0x21   :  { %1047 = vmatprep.subr.bf16.mxu1 %v1150_v23 }
  0x22   :  { %1018 = vmatmul.mubr.bf16.vlgmr.msra.gmra.mrb[0].mxu0 %v1136_v9 }
  0x23   :  { %1021 = vmatprep.mubr.bf16.mxu0 %v1137_v10 }
  0x24   :  { %1048 = vmatpush3.bf16.msra.mxu1 %v1150_v23 }
  0x2a   :  { %1022 = vmatmul.mubr.bf16.gmra.mrb[4].mxu0 %v1138_v11 }
  0x2b   :  { %1025 = vmatprep.mubr.bf16.mxu0 %v1139_v12 }
  0x32   :  { %1026 = vmatmul.mubr.bf16.gmra.mrb[8].mxu0 %v1140_v13 }
  0x33   :  { %1029 = vmatprep.mubr.bf16.mxu0 %v1141_v14 }
  0x3a   :  { %1030 = vmatmul.mubr.bf16.gmra.mrb[12].mxu0 %v1142_v15 }
  0xf5   :  { %v1019_v25 = vpop.f32.mrb[0].mxu0 }
  0xf6   :  { %v1415_v26 = vadd.f32 %v1019_v25, %v1412_v24  ;;  %v197_v27 = vpop.f32.mrb[1].mxu0 }
  0xf7   :  { %v1418_v28 = vadd.f32 %v1412_v24, %v197_v27  ;;  %v1020_v29 = vpop.f32.mrb[2].mxu0 }
  0xf8   :  { %v262_v30 = vsub.f32 0.0, %v1415_v26  ;;  %v1422_v31 = vadd.f32 %v1020_v29, %v1412_v24  ;;  %v200_v32 = vpop.f32.mrb[3].mxu0 }
  0xf9   :  { %v260_v33 = vsub.f32 0.0, %v1418_v28  ;;  %v1426_v34 = vadd.f32 %v1412_v24, %v200_v32 }
  0xfa   :  { %v280_v35 = vmul.f32 1.442695, %v262_v30  ;;  %v263_v36 = vsub.f32 0.0, %v1422_v31 }
  0xfb   :  { %v276_v37 = vmul.f32 1.442695, %v260_v33  ;;  %v261_v38 = vsub.f32 0.0, %v1426_v34 }
  0xfc   :  { %1167 = vpow2.f32 %v280_v35  ;;  %v282_v39 = vmul.f32 1.442695, %v263_v36 }
  0xfd   :  { %1169 = vpow2.f32 %v276_v37  ;;  %v278_v40 = vmul.f32 1.442695, %v261_v38  ;;  %v1023_v41 = vpop.f32.mrb[4].mxu0 }
  0xfe   :  { %1171 = vpow2.f32 %v282_v39  ;;  %v1431_v42 = vadd.f32 %v1023_v41, %v1412_v24  ;;  %v213_v43 = vpop.f32.mrb[5].mxu0 }
  0xff   :  { %1173 = vpow2.f32 %v278_v40  ;;  %v1434_v44 = vadd.f32 %v1412_v24, %v213_v43  ;;  %v1024_v45 = vpop.f32.mrb[6].mxu0 }
 0x100   :  { %v266_v46 = vsub.f32 0.0, %v1431_v42  ;;  %v1438_v47 = vadd.f32 %v1024_v45, %v1412_v24  ;;  %v216_v48 = vpop.f32.mrb[7].mxu0 }
 0x101   :  { %v264_v49 = vsub.f32 0.0, %v1434_v44  ;;  %v1442_v50 = vadd.f32 %v1412_v24, %v216_v48 }
 0x102   :  { %v288_v51 = vmul.f32 1.442695, %v266_v46  ;;  %v267_v52 = vsub.f32 0.0, %v1438_v47 }
 0x103   :  { %v284_v53 = vmul.f32 1.442695, %v264_v49  ;;  %v265_v54 = vsub.f32 0.0, %v1442_v50 }
 0x104   :  { %1175 = vpow2.f32 %v288_v51  ;;  %v290_v55 = vmul.f32 1.442695, %v267_v52 }
 0x105   :  { %1177 = vpow2.f32 %v284_v53  ;;  %v286_v56 = vmul.f32 1.442695, %v265_v54  ;;  %v1027_v57 = vpop.f32.mrb[8].mxu0 }
 0x106   :  { %v1168_v58 = vpop.eup %1167  ;;  %1179 = vpow2.f32 %v290_v55  ;;  %v1447_v59 = vadd.f32 %v1027_v57, %v1412_v24  ;;  %v229_v60 = vpop.f32.mrb[9].mxu0 }
 0x107   :  { %v1170_v61 = vpop.eup %1169  ;;  %v310_v62 = vadd.f32 1.0, %v1168_v58  ;;  %1181 = vpow2.f32 %v286_v56  ;;  %v1450_v63 = vadd.f32 %v1412_v24, %v229_v60  ;;  %v1028_v0 = vpop.f32.mrb[10].mxu0 }
 0x108   :  { %v1172_v1 = vpop.eup %1171  ;;  %v308_v2 = vadd.f32 1.0, %v1170_v61  ;;  %v270_v3 = vsub.f32 0.0, %v1447_v59  ;;  %v1454_v4 = vadd.f32 %v1028_v0, %v1412_v24  ;;  %v232_v5 = vpop.f32.mrb[11].mxu0 }
 0x109   :  { %v1174_v6 = vpop.eup %1173  ;;  %1183 = vrcp.f32 %v310_v62  ;;  %v311_v7 = vadd.f32 1.0, %v1172_v1  ;;  %v268_v8 = vsub.f32 0.0, %v1450_v63  ;;  %v1458_v9 = vadd.f32 %v1412_v24, %v232_v5 }
 0x10a   :  { %1185 = vrcp.f32 %v308_v2  ;;  %v309_v10 = vadd.f32 1.0, %v1174_v6  ;;  %v296_v11 = vmul.f32 1.442695, %v270_v3  ;;  %v271_v12 = vsub.f32 0.0, %v1454_v4 }
 0x10b   :  { %1187 = vrcp.f32 %v311_v7  ;;  %v292_v13 = vmul.f32 1.442695, %v268_v8  ;;  %v269_v14 = vsub.f32 0.0, %v1458_v9 }
 0x10c   :  { %1189 = vrcp.f32 %v309_v10  ;;  %v298_v15 = vmul.f32 1.442695, %v271_v12 }
 0x10d   :  { %1191 = vpow2.f32 %v296_v11  ;;  %v294_v16 = vmul.f32 1.442695, %v269_v14  ;;  %v1031_v17 = vpop.f32.mrb[12].mxu0 }
 0x10e   :  { %v1176_v18 = vpop.eup %1175  ;;  %1193 = vpow2.f32 %v292_v13  ;;  %v1463_v19 = vadd.f32 %v1031_v17, %v1412_v24  ;;  %v245_v20 = vpop.f32.mrb[13].mxu0 }
 0x10f   :  { %v1178_v21 = vpop.eup %1177  ;;  %v314_v22 = vadd.f32 1.0, %v1176_v18  ;;  %1195 = vpow2.f32 %v298_v15  ;;  %v1466_v23 = vadd.f32 %v1412_v24, %v245_v20  ;;  %v1032_v25 = vpop.f32.mrb[14].mxu0 }
 0x110   :  { %v1180_v27 = vpop.eup %1179  ;;  %v312_v29 = vadd.f32 1.0, %v1178_v21  ;;  %1197 = vpow2.f32 %v294_v16  ;;  %v274_v30 = vsub.f32 0.0, %v1463_v19  ;;  %v1470_v32 = vadd.f32 %v1032_v25, %v1412_v24  ;;  %v248_v33 = vpop.f32.mrb[15].mxu0 }
 0x111   :  { %v1182_v35 = vpop.eup %1181  ;;  %1199 = vrcp.f32 %v314_v22  ;;  %v315_v36 = vadd.f32 1.0, %v1180_v27  ;;  %v272_v37 = vsub.f32 0.0, %v1466_v23  ;;  %v1474_v38 = vadd.f32 %v1412_v24, %v248_v33 }
 0x112   :  { %1201 = vrcp.f32 %v312_v29  ;;  %v313_v39 = vadd.f32 1.0, %v1182_v35  ;;  %v304_v40 = vmul.f32 1.442695, %v274_v30  ;;  %v275_v41 = vsub.f32 0.0, %v1470_v32 }
 0x113   :  { %v1184_v43 = vpop.eup %1183  ;;  %1203 = vrcp.f32 %v315_v36  ;;  %v300_v45 = vmul.f32 1.442695, %v272_v37  ;;  %v273_v46 = vsub.f32 0.0, %v1474_v38 }
 0x114   :  { %v1186_v48 = vpop.eup %1185  ;;  %1205 = vrcp.f32 %v313_v39  ;;  %v306_v49 = vmul.f32 1.442695, %v275_v41  ;;  %v342_v24 = vmul.f32 %v1184_v43, %v1415_v26 }
 0x115   :  { %v1188_v51 = vpop.eup %1187  ;;  %1207 = vpow2.f32 %v304_v40  ;;  %v302_v52 = vmul.f32 1.442695, %v273_v46  ;;  %v340_v56 = vmul.f32 %v1186_v48, %v1418_v28  ;;  %v1156_v46 = vld [vmem:[%s1673_s3 + $0x28] sm:$0xff]   ;;  %v1157_v48 = vld [vmem:[%s1673_s3 + $0x30] sm:$0xff]  }
 0x116   :  { %v1190_v53 = vpop.eup %1189  ;;  %v343_v54 = vmul.f32 %v1188_v51, %v1422_v31  ;;  %1209 = vpow2.f32 %v300_v45  ;;  %v1155_v45 = vld [vmem:[%s1673_s3 + $0x20] sm:$0xff]  }
 0x117   :  { %v1192_v55 = vpop.eup %1191  ;;  %1211 = vpow2.f32 %v306_v49  ;;  %v341_v57 = vmul.f32 %v1190_v53, %v1426_v34  ;;  %v1531_v49 = vld [vmem:[%s1672_s5 + $0x1] ss:$0 sm:$0xff] }
 0x118   :  { %v1194_v58 = vpop.eup %1193  ;;  %v318_v60 = vadd.f32 1.0, %v1192_v55  ;;  %1213 = vpow2.f32 %v302_v52  ;;  %v357_v61 = vpack.c.bf16 %v343_v54, %v342_v24 }
 0x119   :  { %v1196_v62 = vpop.eup %1195  ;;  %v316_v0 = vadd.f32 1.0, %v1194_v58  ;;  %v356_v1 = vpack.c.bf16 %v341_v57, %v340_v56 }
 0x11a   :  { %v1198_v2 = vpop.eup %1197  ;;  %1215 = vrcp.f32 %v318_v60  ;;  %v319_v3 = vadd.f32 1.0, %v1196_v62 }
 0x11b   :  { %v1200_v26 = vpop.eup %1199  ;;  %1217 = vrcp.f32 %v316_v0  ;;  %v317_v31 = vadd.f32 1.0, %v1198_v2  ;;  %1049 = vmatprep.mubr.bf16.mxu1 %v356_v1 }
 0x11c   :  { %v1202_v5 = vpop.eup %1201  ;;  %1219 = vrcp.f32 %v319_v3  ;;  %1050 = vmatmul.mubr.bf16.vlgmr.msra.gmra.mrb[0].mxu1 %v357_v61  ;;  %v346_v6 = vmul.f32 %v1200_v26, %v1431_v42 }
 0x11d   :  { %v1204_v28 = vpop.eup %1203  ;;  %1221 = vrcp.f32 %v317_v31  ;;  %v344_v10 = vmul.f32 %v1202_v5, %v1434_v44 }
 0x11e   :  { %v1206_v34 = vpop.eup %1205  ;;  %v347_v7 = vmul.f32 %v1204_v28, %v1438_v47 }
 0x11f   :  { %v1208_v8 = vpop.eup %1207  ;;  %v345_v11 = vmul.f32 %v1206_v34, %v1442_v50 }
 0x120   :  { %v1210_v12 = vpop.eup %1209  ;;  %v322_v13 = vadd.f32 1.0, %v1208_v8  ;;  %v359_v14 = vpack.c.bf16 %v347_v7, %v346_v6 }
 0x121   :  { %v1212_v15 = vpop.eup %1211  ;;  %v320_v16 = vadd.f32 1.0, %v1210_v12  ;;  %v358_v17 = vpack.c.bf16 %v345_v11, %v344_v10 }
 0x122   :  { %v1214_v18 = vpop.eup %1213  ;;  %1223 = vrcp.f32 %v322_v13  ;;  %v323_v20 = vadd.f32 1.0, %v1212_v15 }
 0x123   :  { %1225 = vrcp.f32 %v320_v16  ;;  %v321_v21 = vadd.f32 1.0, %v1214_v18  ;;  %1053 = vmatprep.mubr.bf16.mxu1 %v358_v17 }
 0x124   :  { %v1216_v42 = vpop.eup %1215  ;;  %1227 = vrcp.f32 %v323_v20  ;;  %1054 = vmatmul.mubr.bf16.gmra.mrb[4].mxu1 %v359_v14 }
 0x125   :  { %v1218_v47 = vpop.eup %1217  ;;  %1229 = vrcp.f32 %v321_v21  ;;  %v350_v50 = vmul.f32 %v1216_v42, %v1447_v59 }
 0x126   :  { %v1220_v44 = vpop.eup %1219  ;;  %v348_v27 = vmul.f32 %v1218_v47, %v1450_v63 }
 0x127   :  { %v1222_v22 = vpop.eup %1221  ;;  %v351_v25 = vmul.f32 %v1220_v44, %v1454_v4 }
 0x128   :  { %v349_v29 = vmul.f32 %v1222_v22, %v1458_v9  ;;  %v1295_v9 = vmov 0.0  }
 0x129   :  { %v361_v30 = vpack.c.bf16 %v351_v25, %v350_v50  ;;  %1065 = vmatprep.subr.bf16.mxu0 %v1295_v9  ;;  %1085 = vmatprep.subr.bf16.mxu1 %v1295_v9 }
 0x12a   :  { %v360_v33 = vpack.c.bf16 %v349_v29, %v348_v27  ;;  %1081 = vmatprep.mubr.msk.bf16.mxu0 %vm1296_vm0, %v1295_v9 }
 0x12c   :  { %v1224_v35 = vpop.eup %1223  ;;  %1057 = vmatprep.mubr.bf16.mxu1 %v360_v33 }
 0x12d   :  { %v1226_v36 = vpop.eup %1225  ;;  %1058 = vmatmul.mubr.bf16.gmra.mrb[8].mxu1 %v361_v30  ;;  %v354_v40 = vmul.f32 %v1224_v35, %v1463_v19  ;;  %v1151_v19 = vld [vmem:[%s1673_s3] sm:$0xff]  }
 0x12e   :  { %v1228_v37 = vpop.eup %1227  ;;  %v352_v59 = vmul.f32 %v1226_v36, %v1466_v23  ;;  %1086 = vmatpush3.bf16.msra.mxu1 %v1151_v19  ;;  %v1152_v23 = vld [vmem:[%s1673_s3 + $0x8] sm:$0xff]  }
 0x12f   :  { %v1230_v39 = vpop.eup %1229  ;;  %v355_v41 = vmul.f32 %v1228_v37, %v1470_v32  ;;  %1087 = vmatprep.subr.bf16.mxu1 %v1295_v9  ;;  %v1153_v32 = vld [vmem:[%s1673_s3 + $0x10] sm:$0xff]  }
 0x130   :  { %v353_v4 = vmul.f32 %v1230_v39, %v1474_v38  ;;  %v1154_v38 = vld [vmem:[%s1673_s3 + $0x18] sm:$0xff]  }
 0x131   :  { %v363_v43 = vpack.c.bf16 %v355_v41, %v354_v40 }
 0x132   :  { %v362_v63 = vpack.c.bf16 %v353_v4, %v352_v59  ;;  %1088 = vmatpush3.bf16.msra.mxu1 %v1152_v23 }
 0x133   :  { %1089 = vmatprep.subr.bf16.mxu1 %v1295_v9 }
 0x134   :  { %1061 = vmatprep.mubr.bf16.mxu1 %v362_v63 }
 0x135   :  { %1062 = vmatmul.mubr.bf16.gmra.mrb[12].mxu1 %v363_v43 }
 0x136   :  { %1101 = vmatprep.mubr.msk.bf16.mxu1 %vm1296_vm0, %v1295_v9  ;;  %1090 = vmatpush3.bf16.msra.mxu1 %v1153_v32 }
 0x137   :  { %1091 = vmatprep.subr.bf16.mxu1 %v1295_v9 }
 0x13a   :  { %1092 = vmatpush3.bf16.msra.mxu1 %v1154_v38 }
 0x13b   :  { %1093 = vmatprep.subr.bf16.mxu1 %v1295_v9 }
 0x13e   :  { %1094 = vmatpush3.bf16.msra.mxu1 %v1155_v45 }
 0x13f   :  { %1095 = vmatprep.subr.bf16.mxu1 %v1295_v9 }
 0x142   :  { %1096 = vmatpush3.bf16.msra.mxu1 %v1156_v46 }
 0x143   :  { %1097 = vmatprep.subr.bf16.mxu1 %v1295_v9 }
 0x146   :  { %1098 = vmatpush3.bf16.msra.mxu1 %v1157_v48 }
 0x147   :  { %1099 = vmatprep.subr.bf16.mxu1 %v1295_v9 }
 0x1ef   :  { %v1051_v51 = vpop.f32.mrb[0].mxu1 }
 0x1f0   :  { %v1534_v52 = vadd.f32 %v1051_v51, %v1531_v49  ;;  %v466_v53 = vpop.f32.mrb[1].mxu1 }
 0x1f1   :  { %v1537_v24 = vadd.f32 %v1531_v49, %v466_v53  ;;  %v1052_v54 = vpop.f32.mrb[2].mxu1 }
 0x1f2   :  { %v531_v55 = vsub.f32 0.0, %v1534_v52  ;;  %v1541_v56 = vadd.f32 %v1052_v54, %v1531_v49  ;;  %v469_v57 = vpop.f32.mrb[3].mxu1 }
 0x1f3   :  { %v529_v58 = vsub.f32 0.0, %v1537_v24  ;;  %v1545_v60 = vadd.f32 %v1531_v49, %v469_v57 }
 0x1f4   :  { %v549_v61 = vmul.f32 1.442695, %v531_v55  ;;  %v532_v62 = vsub.f32 0.0, %v1541_v56 }
 0x1f5   :  { %v545_v0 = vmul.f32 1.442695, %v529_v58  ;;  %v530_v1 = vsub.f32 0.0, %v1545_v60 }
 0x1f6   :  { %1231 = vpow2.f32 %v549_v61  ;;  %v551_v2 = vmul.f32 1.442695, %v532_v62 }
 0x1f7   :  { %1233 = vpow2.f32 %v545_v0  ;;  %v547_v3 = vmul.f32 1.442695, %v530_v1  ;;  %v1055_v26 = vpop.f32.mrb[4].mxu1 }
 0x1f8   :  { %1235 = vpow2.f32 %v551_v2  ;;  %v1550_v31 = vadd.f32 %v1055_v26, %v1531_v49  ;;  %v482_v5 = vpop.f32.mrb[5].mxu1 }
 0x1f9   :  { %1237 = vpow2.f32 %v547_v3  ;;  %v1553_v28 = vadd.f32 %v1531_v49, %v482_v5  ;;  %v1056_v34 = vpop.f32.mrb[6].mxu1 }
 0x1fa   :  { %v535_v6 = vsub.f32 0.0, %v1550_v31  ;;  %v1557_v7 = vadd.f32 %v1056_v34, %v1531_v49  ;;  %v485_v8 = vpop.f32.mrb[7].mxu1 }
 0x1fb   :  { %v533_v10 = vsub.f32 0.0, %v1553_v28  ;;  %v1561_v11 = vadd.f32 %v1531_v49, %v485_v8 }
 0x1fc   :  { %v557_v12 = vmul.f32 1.442695, %v535_v6  ;;  %v536_v13 = vsub.f32 0.0, %v1557_v7 }
 0x1fd   :  { %v553_v14 = vmul.f32 1.442695, %v533_v10  ;;  %v534_v15 = vsub.f32 0.0, %v1561_v11 }
 0x1fe   :  { %1239 = vpow2.f32 %v557_v12  ;;  %v559_v16 = vmul.f32 1.442695, %v536_v13 }
 0x1ff   :  { %1241 = vpow2.f32 %v553_v14  ;;  %v555_v17 = vmul.f32 1.442695, %v534_v15 }
 0x200   :  { %v1232_v18 = vpop.eup %1231  ;;  %1243 = vpow2.f32 %v559_v16  ;;  %v1059_v20 = vpop.f32.mrb[8].mxu1 }
 0x201   :  { %v1234_v21 = vpop.eup %1233  ;;  %v579_v42 = vadd.f32 1.0, %v1232_v18  ;;  %1245 = vpow2.f32 %v555_v17  ;;  %v1566_v47 = vadd.f32 %v1059_v20, %v1531_v49  ;;  %v498_v44 = vpop.f32.mrb[9].mxu1 }
 0x202   :  { %v1236_v22 = vpop.eup %1235  ;;  %v577_v50 = vadd.f32 1.0, %v1234_v21  ;;  %v1569_v25 = vadd.f32 %v1531_v49, %v498_v44  ;;  %v1060_v27 = vpop.f32.mrb[10].mxu1 }
 0x203   :  { %v1238_v29 = vpop.eup %1237  ;;  %1247 = vrcp.f32 %v579_v42  ;;  %v580_v30 = vadd.f32 1.0, %v1236_v22  ;;  %v539_v33 = vsub.f32 0.0, %v1566_v47  ;;  %v1573_v35 = vadd.f32 %v1060_v27, %v1531_v49  ;;  %v501_v36 = vpop.f32.mrb[11].mxu1 }
 0x204   :  { %1249 = vrcp.f32 %v577_v50  ;;  %v578_v37 = vadd.f32 1.0, %v1238_v29  ;;  %v537_v39 = vsub.f32 0.0, %v1569_v25  ;;  %v1577_v40 = vadd.f32 %v1531_v49, %v501_v36 }
 0x205   :  { %1251 = vrcp.f32 %v580_v30  ;;  %v565_v41 = vmul.f32 1.442695, %v539_v33  ;;  %v540_v59 = vsub.f32 0.0, %v1573_v35 }
 0x206   :  { %1253 = vrcp.f32 %v578_v37  ;;  %v561_v4 = vmul.f32 1.442695, %v537_v39  ;;  %v538_v43 = vsub.f32 0.0, %v1577_v40 }
 0x207   :  { %1255 = vpow2.f32 %v565_v41  ;;  %v567_v63 = vmul.f32 1.442695, %v540_v59 }
 0x208   :  { %v1240_v19 = vpop.eup %1239  ;;  %1257 = vpow2.f32 %v561_v4  ;;  %v563_v23 = vmul.f32 1.442695, %v538_v43  ;;  %v1063_v32 = vpop.f32.mrb[12].mxu1 }
 0x209   :  { %v1242_v38 = vpop.eup %1241  ;;  %v583_v45 = vadd.f32 1.0, %v1240_v19  ;;  %1259 = vpow2.f32 %v567_v63  ;;  %v1582_v46 = vadd.f32 %v1063_v32, %v1531_v49  ;;  %v514_v48 = vpop.f32.mrb[13].mxu1 }
 0x20a   :  { %v1244_v51 = vpop.eup %1243  ;;  %v581_v53 = vadd.f32 1.0, %v1242_v38  ;;  %1261 = vpow2.f32 %v563_v23  ;;  %v1585_v54 = vadd.f32 %v1531_v49, %v514_v48  ;;  %v1064_v55 = vpop.f32.mrb[14].mxu1 }
 0x20b   :  { %v1246_v57 = vpop.eup %1245  ;;  %1263 = vrcp.f32 %v583_v45  ;;  %v584_v58 = vadd.f32 1.0, %v1244_v51  ;;  %v543_v61 = vsub.f32 0.0, %v1582_v46  ;;  %v1589_v62 = vadd.f32 %v1064_v55, %v1531_v49  ;;  %v517_v0 = vpop.f32.mrb[15].mxu1 }
 0x20c   :  { %1265 = vrcp.f32 %v581_v53  ;;  %v582_v1 = vadd.f32 1.0, %v1246_v57  ;;  %v541_v2 = vsub.f32 0.0, %v1585_v54  ;;  %v1593_v3 = vadd.f32 %v1531_v49, %v517_v0 }
 0x20d   :  { %v1248_v26 = vpop.eup %1247  ;;  %1267 = vrcp.f32 %v584_v58  ;;  %v573_v5 = vmul.f32 1.442695, %v543_v61  ;;  %v544_v34 = vsub.f32 0.0, %v1589_v62 }
 0x20e   :  { %v1250_v6 = vpop.eup %1249  ;;  %1269 = vrcp.f32 %v582_v1  ;;  %v569_v8 = vmul.f32 1.442695, %v541_v2  ;;  %v542_v10 = vsub.f32 0.0, %v1593_v3  ;;  %v611_v15 = vmul.f32 %v1248_v26, %v1534_v52 }
 0x20f   :  { %v1252_v12 = vpop.eup %1251  ;;  %1271 = vpow2.f32 %v573_v5  ;;  %v575_v13 = vmul.f32 1.442695, %v544_v34  ;;  %v609_v18 = vmul.f32 %v1250_v6, %v1537_v24  ;;  %v625_v6 = vld [vmem:[%s1674_s6] sm:$0xf] }
 0x210   :  { %v1254_v14 = vpop.eup %1253  ;;  %v612_v16 = vmul.f32 %v1252_v12, %v1541_v56  ;;  %1273 = vpow2.f32 %v569_v8  ;;  %v571_v49 = vmul.f32 1.442695, %v542_v10  ;;  %v1162_v8 = vld [vmem:[%s1675_s4 + $0x18] sm:$0xff]   ;;  %v1163_v10 = vld [vmem:[%s1675_s4 + $0x20] sm:$0xff]   ;;  %v1164_v12 = vld [vmem:[%s1675_s4 + $0x28] sm:$0xff]  }
 0x211   :  { %v1256_v17 = vpop.eup %1255  ;;  %v610_v20 = vmul.f32 %v1254_v14, %v1545_v60  ;;  %1275 = vpow2.f32 %v575_v13 }
 0x212   :  { %v1258_v21 = vpop.eup %1257  ;;  %v627_v42 = vpack.c.bf16 %v612_v16, %v611_v15  ;;  %v587_v44 = vadd.f32 1.0, %v1256_v17  ;;  %1277 = vpow2.f32 %v571_v49  ;;  %v1165_v17 = vld [vmem:[%s1675_s4 + $0x30] sm:$0xff]  }
 0x213   :  { %v1260_v22 = vpop.eup %1259  ;;  %v626_v50 = vpack.c.bf16 %v610_v20, %v609_v18  ;;  %v585_v27 = vadd.f32 1.0, %v1258_v21  ;;  %v1166_v18 = vld [vmem:[%s1675_s4 + $0x38] sm:$0xff]   ;;  %v924_v20 = vld [vmem:[%s1672_s5 + $0x2] ss:$0 sm:$0xff] }
 0x214   :  { %v1262_v29 = vpop.eup %1261  ;;  %1279 = vrcp.f32 %v587_v44  ;;  %v588_v52 = vadd.f32 1.0, %v1260_v22 }
 0x215   :  { %v1264_v30 = vpop.eup %1263  ;;  %1281 = vrcp.f32 %v585_v27  ;;  %v586_v56 = vadd.f32 1.0, %v1262_v29  ;;  %1066 = vmatpush3.bf16.msra.mxu0 %v626_v50 }
 0x216   :  { %v1266_v33 = vpop.eup %1265  ;;  %1283 = vrcp.f32 %v588_v52  ;;  %1067 = vmatprep.subr.bf16.mxu0 %v1295_v9  ;;  %v615_v36 = vmul.f32 %v1264_v30, %v1550_v31 }
 0x217   :  { %v1268_v24 = vpop.eup %1267  ;;  %1285 = vrcp.f32 %v586_v56  ;;  %v613_v41 = vmul.f32 %v1266_v33, %v1553_v28 }
 0x218   :  { %v1270_v60 = vpop.eup %1269  ;;  %v616_v37 = vmul.f32 %v1268_v24, %v1557_v7 }
 0x219   :  { %v1272_v39 = vpop.eup %1271  ;;  %v614_v59 = vmul.f32 %v1270_v60, %v1561_v11  ;;  %1068 = vmatpush3.bf16.msra.mxu0 %v627_v42 }
 0x21a   :  { %v1274_v4 = vpop.eup %1273  ;;  %v629_v43 = vpack.c.bf16 %v616_v37, %v615_v36  ;;  %v591_v63 = vadd.f32 1.0, %v1272_v39  ;;  %1069 = vmatprep.subr.bf16.mxu0 %v1295_v9 }
 0x21b   :  { %v1276_v19 = vpop.eup %1275  ;;  %v628_v23 = vpack.c.bf16 %v614_v59, %v613_v41  ;;  %v589_v32 = vadd.f32 1.0, %v1274_v4 }
 0x21c   :  { %v1278_v38 = vpop.eup %1277  ;;  %1287 = vrcp.f32 %v591_v63  ;;  %v592_v45 = vadd.f32 1.0, %v1276_v19 }
 0x21d   :  { %1289 = vrcp.f32 %v589_v32  ;;  %v590_v31 = vadd.f32 1.0, %v1278_v38  ;;  %1070 = vmatpush3.bf16.msra.mxu0 %v628_v23 }
 0x21e   :  { %v1280_v7 = vpop.eup %1279  ;;  %1291 = vrcp.f32 %v592_v45  ;;  %1071 = vmatprep.subr.bf16.mxu0 %v1295_v9 }
 0x21f   :  { %v1282_v28 = vpop.eup %1281  ;;  %1293 = vrcp.f32 %v590_v31  ;;  %v619_v51 = vmul.f32 %v1280_v7, %v1566_v47 }
 0x220   :  { %v1284_v11 = vpop.eup %1283  ;;  %v617_v55 = vmul.f32 %v1282_v28, %v1569_v25 }
 0x221   :  { %v1286_v48 = vpop.eup %1285  ;;  %v620_v53 = vmul.f32 %v1284_v11, %v1573_v35  ;;  %1072 = vmatpush3.bf16.msra.mxu0 %v629_v43 }
 0x222   :  { %v618_v57 = vmul.f32 %v1286_v48, %v1577_v40  ;;  %1073 = vmatprep.subr.bf16.mxu0 %v1295_v9 }
 0x223   :  { %v631_v58 = vpack.c.bf16 %v620_v53, %v619_v51 }
 0x224   :  { %v630_v61 = vpack.c.bf16 %v618_v57, %v617_v55 }
 0x226   :  { %v1288_v0 = vpop.eup %1287  ;;  %1074 = vmatpush3.bf16.msra.mxu0 %v630_v61 }
 0x227   :  { %v1290_v1 = vpop.eup %1289  ;;  %1075 = vmatprep.subr.bf16.mxu0 %v1295_v9  ;;  %v623_v47 = vmul.f32 %v1288_v0, %v1582_v46  ;;  %v1158_v46 = vld [vmem:[%s1673_s3 + $0x38] sm:$0xff]  }
 0x228   :  { %v1292_v2 = vpop.eup %1291  ;;  %v621_v5 = vmul.f32 %v1290_v1, %v1585_v54  ;;  %1100 = vmatpush3.bf16.msra.mxu1 %v1158_v46  ;;  %v1159_v54 = vld [vmem:[%s1675_s4] sm:$0xff]  }
 0x229   :  { %v1294_v26 = vpop.eup %1293  ;;  %v624_v35 = vmul.f32 %v1292_v2, %v1589_v62  ;;  %v1160_v62 = vld [vmem:[%s1675_s4 + $0x8] sm:$0xff]  }
 0x22a   :  { %v622_v25 = vmul.f32 %v1294_v26, %v1593_v3  ;;  %1076 = vmatpush3.bf16.msra.mxu0 %v631_v58  ;;  %v1161_v3 = vld [vmem:[%s1675_s4 + $0x10] sm:$0xff]  }
 0x22b   :  { %v633_v40 = vpack.c.bf16 %v624_v35, %v623_v47  ;;  %1077 = vmatprep.subr.bf16.mxu0 %v1295_v9 }
 0x22c   :  { %v632_v34 = vpack.c.bf16 %v622_v25, %v621_v5 }
 0x22e   :  { %1078 = vmatpush3.bf16.msra.mxu0 %v632_v34 }
 0x22f   :  { %1079 = vmatprep.subr.bf16.mxu0 %v1295_v9 }
 0x232   :  { %1080 = vmatpush3.bf16.msra.mxu0 %v633_v40 }
 0x233   :  { %1105 = vmatprep.subr.bf16.mxu0 %v1295_v9 }
 0x235   :  { %1082 = vmatmul.mubr.bf16.vlgmr.msra.gmra.mrb[16].mxu0 %v625_v6 }
 0x236   :  { %1121 = vmatprep.mubr.msk.bf16.mxu0 %vm1296_vm0, %v1295_v9  ;;  %1106 = vmatpush3.bf16.msra.mxu0 %v1159_v54 }
 0x237   :  { %1107 = vmatprep.subr.bf16.mxu0 %v1295_v9 }
 0x23a   :  { %1108 = vmatpush3.bf16.msra.mxu0 %v1160_v62 }
 0x23b   :  { %1109 = vmatprep.subr.bf16.mxu0 %v1295_v9 }
 0x23e   :  { %1110 = vmatpush3.bf16.msra.mxu0 %v1161_v3 }
 0x23f   :  { %1111 = vmatprep.subr.bf16.mxu0 %v1295_v9 }
 0x242   :  { %1112 = vmatpush3.bf16.msra.mxu0 %v1162_v8 }
 0x243   :  { %1113 = vmatprep.subr.bf16.mxu0 %v1295_v9 }
 0x246   :  { %1114 = vmatpush3.bf16.msra.mxu0 %v1163_v10 }
 0x247   :  { %1115 = vmatprep.subr.bf16.mxu0 %v1295_v9 }
 0x24a   :  { %1116 = vmatpush3.bf16.msra.mxu0 %v1164_v12 }
 0x24b   :  { %1117 = vmatprep.subr.bf16.mxu0 %v1295_v9 }
 0x24e   :  { %1118 = vmatpush3.bf16.msra.mxu0 %v1165_v17 }
 0x24f   :  { %1119 = vmatprep.subr.bf16.mxu0 %v1295_v9  ;;  %v933_v9 = vld [vmem:[%s1672_s5 + $0x3] ss:$0 sm:$0xff] }
 0x252   :  { %1120 = vmatpush3.bf16.msra.mxu0 %v1166_v18 }
 0x308   :  { %v668_v13 = vpop.f32.mrb[16].mxu0 }
 0x309   :  { %v674_v14 = vpack.c.bf16 %v668_v13, %v668_v13  ;;  %v1083_v15 = vpop.f32.mrb[17].mxu0 }
 0x30a   :  { %v671_v16 = vpop.f32.mrb[18].mxu0 }
 0x30b   :  { %v1084_v49 = vpop.f32.mrb[19].mxu0  ;;  %1102 = vmatmul.mubr.bf16.vlgmr.msra.gmra.mrb[16].mxu1 %v674_v14 }
 0x3de   :  { %v777_v21 = vpop.f32.mrb[16].mxu1 }
 0x3df   :  { %v778_v42 = vadd.f32 %v924_v20, %v777_v21  ;;  %v1103_v44 = vpop.f32.mrb[17].mxu1 }
 0x3e0   :  { %v780_v22 = vpop.f32.mrb[18].mxu1 }
 0x3e1   :  { %v783_v50 = vmax.f32 %v778_v42, 0.0  ;;  %v1104_v27 = vpop.f32.mrb[19].mxu1 }
 0x3e3   :  { %v784_v29 = vpack.c.bf16 %v783_v50, %v783_v50 }
 0x3e5   :  { %1122 = vmatmul.mubr.bf16.vlgmr.msra.gmra.mrb[20].mxu0 %v784_v29 }
 0x4b8   :  { %v887_v52 = vpop.f32.mrb[20].mxu0 }
 0x4b9   :  { %v888_v30 = vadd.f32 %v933_v9, %v887_v52  ;;  %v1123_v56 = vpop.f32.mrb[21].mxu0 }
 0x4ba   :  { %v890_v33 = vpop.f32.mrb[22].mxu0 }
 0x4bb   :  { %893 = vst [vmem:[%s1676_s7] sm:$0xff] %v888_v30  ;;  %v1124_v24 = vpop.f32.mrb[23].mxu0 }

</bundles_post_ra>
